<compile_context>
chip_gen: v7x
topology: tpu7x:2x2x1
jax: 0.10.0
libtpu: 0.0.40
codegen_flags: <defaults>
</compile_context>

<pallas_src>
import numpy as np
import jax
import jax.numpy as jnp
from jax.experimental import pallas as pl
from jax.experimental.pallas import tpu as pltpu


# ----------------------------------------------------------------------------
# Host-side interpolation-matrix builders (pure numpy glue, cacheable)
# ----------------------------------------------------------------------------
def _round_up(x, m):
    return ((x + m - 1) // m) * m


def _bilinear_matrix(in_size, out_size):
    """(out_size, in_size) matrix reproducing F.interpolate(mode='bilinear',
    align_corners=False) along one axis."""
    scale = in_size / out_size
    dst = np.arange(out_size, dtype=np.float64)
    src = (dst + 0.5) * scale - 0.5
    src = np.maximum(src, 0.0)                      # PyTorch clamps negatives to 0
    i0 = np.clip(np.floor(src).astype(np.int64), 0, in_size - 1)
    i1 = np.minimum(i0 + 1, in_size - 1)
    w1 = src - i0
    w0 = 1.0 - w1
    M = np.zeros((out_size, in_size), dtype=np.float64)
    np.add.at(M, (np.arange(out_size), i0), w0)
    np.add.at(M, (np.arange(out_size), i1), w1)
    return M


def _nearest_matrix(in_size, out_size, in_pad):
    """(out_size, in_pad) 0/1 matrix reproducing F.interpolate(mode='nearest')
    along one axis, reading only the first `in_size` columns of an axis of
    length `in_pad` (i.e. the crop of the padded axis is folded in)."""
    dst = np.arange(out_size, dtype=np.float64)
    src = np.minimum(np.floor(dst * (in_size / out_size)).astype(np.int64),
                     in_size - 1)
    M = np.zeros((out_size, in_pad), dtype=np.float64)
    M[np.arange(out_size), src] = 1.0
    return M


def _host_fused_matrices(H, W, max_h, max_w, img_h, img_w, oh, ow):
    """Compose bilinear-upsample + crop + nearest-resize into (L, R) f64."""
    Wy = _bilinear_matrix(H, max_h)                 # (max_h, H)
    Wx = _bilinear_matrix(W, max_w)                 # (max_w, W)
    Sy = _nearest_matrix(img_h, oh, max_h)          # (oh, max_h)   crop folded in
    Sx = _nearest_matrix(img_w, ow, max_w)          # (ow, max_w)   crop folded in
    L = Sy @ Wy                                     # (oh, H)
    R = Wx.T @ Sx.T                                 # (W, ow)
    return L, R


_FUSED_MATRIX_CACHE = {}


def _get_device_matrices(H, W, max_h, max_w, img_h, img_w, oh, ow):
    """Cached, padded bf16 device copies of the composed (L, R) matrices."""
    key = (H, W, max_h, max_w, img_h, img_w, oh, ow)
    hit = _FUSED_MATRIX_CACHE.get(key)
    if hit is not None:
        return hit
    L, R = _host_fused_matrices(H, W, max_h, max_w, img_h, img_w, oh, ow)
    ohp = _round_up(oh, 8)                 # sublane-aligned output rows
    owp = _round_up(ow, 128)               # lane-dense output columns
    Lp = np.zeros((ohp, H), dtype=np.float32)
    Lp[:oh, :] = L
    Rp = np.zeros((W, owp), dtype=np.float32)
    Rp[:, :ow] = R
    entry = (jnp.asarray(Lp, dtype=jnp.bfloat16),
             jnp.asarray(Rp, dtype=jnp.bfloat16), ohp, owp)
    _FUSED_MATRIX_CACHE[key] = entry
    return entry


# ----------------------------------------------------------------------------
# Pallas kernel: out[q] = L @ x[q] @ R for a tile of queries, fused stages
# ----------------------------------------------------------------------------
def _fused_resize_kernel(l_ref, x_ref, r_ref, o_ref):
    # l_ref: (OHP, H)   bf16  fused row map (nearest . crop . bilinear)
    # x_ref: (TQ, H, W) f32   TQ queries of raw mask logits (cast here, in VMEM)
    # r_ref: (W, OWP)   bf16  fused column map, zero-padded to lane-dense OWP
    # o_ref: (TQ, OHP, OWP) f32
    tq, h, w = x_ref.shape
    l = l_ref[...]
    r = r_ref[...]
    x = x_ref[...].astype(jnp.bfloat16)             # in-VMEM cast (HBM stays f32, read once)

    # Contraction order: x @ R first -> intermediate (TQ*H, OWP) is lane-dense
    # and the W-contraction packs all TQ*H rows into a single MXU matmul.
    if h % 16 == 0:
        # (TQ, H) collapsed into M (bf16 sublane-tile aligned: layout no-op).
        t = jnp.dot(x.reshape(tq * h, w), r,
                    preferred_element_type=jnp.float32)          # (TQ*H, OWP)
        t = t.astype(jnp.bfloat16)
        for q in range(tq):                                       # static unroll
            o_ref[q, :, :] = jnp.dot(l, t[q * h:(q + 1) * h, :],
                                     preferred_element_type=jnp.float32)
    else:
        # Fallback for H not tile-aligned: per-query 2-D matmuls.
        for q in range(tq):                                       # static unroll
            t = jnp.dot(x[q], r, preferred_element_type=jnp.float32)
            o_ref[q, :, :] = jnp.dot(l, t.astype(jnp.bfloat16),
                                     preferred_element_type=jnp.float32)


def _choose_query_tile(Q, H, W, OHP, OWP):
    """Query-tile size: fits VMEM (<< 32 MiB scoped default), divides Q (no
    partial blocks), keeps >= 2 'parallel' grid steps when Q >= 2 so v7x's two
    TensorCores both get work, and caps the static unroll at 8 queries."""
    per_q = (2 * H * W * 4          # double-buffered f32 input block
             + H * W * 2            # in-kernel bf16 copy
             + 2 * OHP * OWP * 4    # double-buffered f32 output block
             + H * OWP * 6)         # f32 + bf16 intermediate
    budget = 20 * 1024 * 1024
    cap = max(1, budget // max(per_q, 1))
    tq = max(1, min(Q, cap, 8))
    if Q >= 2:
        tq = min(tq, max(1, (Q + 1) // 2))
    while Q % tq != 0 and tq > 1:   # prefer an exact divisor (no padded blocks)
        tq -= 1
    return tq


def _fused_resize(x_f32, L, R, tq):
    """x_f32: (Q, H, W) f32; L: (OHP, H) bf16; R: (W, OWP) bf16
    -> (Q, OHP, OWP) f32 (padding columns/rows sliced off by the caller)."""
    Q, H, W = x_f32.shape
    OHP = L.shape[0]
    OWP = R.shape[1]
    grid = (pl.cdiv(Q, tq),)
    return pl.pallas_call(
        _fused_resize_kernel,
        out_shape=jax.ShapeDtypeStruct((Q, OHP, OWP), jnp.float32),
        grid=grid,
        in_specs=[
            pl.BlockSpec((OHP, H), lambda i: (0, 0)),
            pl.BlockSpec((tq, H, W), lambda i: (i, 0, 0)),
            pl.BlockSpec((W, OWP), lambda i: (0, 0)),
        ],
        out_specs=pl.BlockSpec((tq, OHP, OWP), lambda i: (i, 0, 0)),
        compiler_params=pltpu.CompilerParams(
            dimension_semantics=("parallel",)),
    )(L, x_f32, R)


# ----------------------------------------------------------------------------
# PostProcessMask.forward equivalent
# ----------------------------------------------------------------------------
def post_process_mask(outputs, orig_target_sizes, max_target_sizes, threshold=0.1):
    """
    outputs: dict with 'pred_mask6' of shape (B, Q, H, W)  (NCHW, C == Q)
    orig_target_sizes / max_target_sizes: length-B sequences of (h, w) Python
      ints (static: per-image output shapes are ragged, so they cannot be
      traced values without bucketing).
    Returns: list of B arrays, each (Q, 1, oh, ow) float32.
    """
    # `threshold` is unused in the reference forward pass as well.
    assert len(orig_target_sizes) == len(max_target_sizes)
    pred = outputs["pred_mask6"]
    B, Q, H, W = pred.shape

    max_h = max(int(t[0]) for t in max_target_sizes)
    max_w = max(int(t[1]) for t in max_target_sizes)

    # Group images with identical (crop, resize) shapes -> one pallas_call per
    # group, with all the group's queries packed along the grid axis.
    groups = {}
    for i in range(B):
        key = (int(max_target_sizes[i][0]), int(max_target_sizes[i][1]),
               int(orig_target_sizes[i][0]), int(orig_target_sizes[i][1]))
        groups.setdefault(key, []).append(i)

    results = [None] * B
    for (img_h, img_w, oh, ow), idxs in groups.items():
        n = len(idxs)
        # Composed (bilinear -> crop -> nearest) matrices, cached per shape.
        L, R, ohp, owp = _get_device_matrices(H, W, max_h, max_w,
                                              img_h, img_w, oh, ow)
        if n == B:
            x = pred.reshape(B * Q, H, W)
        elif n == 1:
            x = pred[idxs[0]]
        else:
            x = pred[jnp.asarray(idxs, dtype=jnp.int32)].reshape(n * Q, H, W)

        tq = _choose_query_tile(x.shape[0], H, W, ohp, owp)
        out = _fused_resize(x, L, R, tq)              # (n*Q, ohp, owp) f32

        # Strip lane/sublane padding, add channel dim (glue).
        out = out[:, :oh, :ow].reshape(n, Q, oh, ow)
        for j, bi in enumerate(idxs):
            results[bi] = out[j][:, None, :, :]       # (Q, 1, oh, ow)
    return results


# ----------------------------------------------------------------------------
# Pure-numpy reference mirroring the PyTorch module (for the self-test)
# ----------------------------------------------------------------------------
def _reference_post_process(pred_np, orig_sizes, max_sizes):
    B, Q, H, W = pred_np.shape
    max_h = max(s[0] for s in max_sizes)
    max_w = max(s[1] for s in max_sizes)
    Wy = _bilinear_matrix(H, max_h)                 # (max_h, H)
    Wx = _bilinear_matrix(W, max_w)                 # (max_w, W)
    up = np.einsum('oh,bqhw,pw->bqop', Wy, pred_np.astype(np.float64), Wx)
    outs = []
    for i in range(B):
        img_h, img_w = max_sizes[i]
        oh, ow = orig_sizes[i]
        crop = up[i][:, :img_h, :img_w]
        ry = np.minimum(np.floor(np.arange(oh) * (img_h / oh)).astype(np.int64),
                        img_h - 1)
        rx = np.minimum(np.floor(np.arange(ow) * (img_w / ow)).astype(np.int64),
                        img_w - 1)
        outs.append(crop[:, ry][:, :, rx][:, None])  # (Q, 1, oh, ow)
    return outs


if __name__ == "__main__":
    key = jax.random.PRNGKey(0)
    B, Q, H, W = 2, 4, 16, 16
    pred_mask6 = jax.random.normal(key, (B, Q, H, W), dtype=jnp.float32)

    # (h, w) pairs — static Python ints (output shapes are ragged per image).
    max_target_sizes = [(24, 20), (18, 24)]
    orig_target_sizes = [(32, 28), (30, 26)]

    results = post_process_mask({"pred_mask6": pred_mask6},
                                orig_target_sizes, max_target_sizes)

    pred_np = np.asarray(jax.device_get(pred_mask6), dtype=np.float64)
    refs = _reference_post_process(pred_np, orig_target_sizes, max_target_sizes)

    for r, ref, (oh, ow) in zip(results, refs, orig_target_sizes):
        r = jax.block_until_ready(r)
        assert r.shape == (Q, 1, oh, ow), r.shape
        assert r.dtype == jnp.float32
        # bf16 operands + f32 accumulate: loose tolerance vs f64 reference.
        np.testing.assert_allclose(np.asarray(r, dtype=np.float64), ref,
                                   rtol=0.05, atol=0.08)

    print("KERNEL_OK")
</pallas_src>

<mosaic_0001>
module attributes {stable_mosaic.version = 11 : i64} {
  func.func @_fused_resize_kernel(%arg0: i32, %arg1: memref<32x16xbf16, #tpu.memory_space<vmem>>, %arg2: memref<2x16x16xf32, #tpu.memory_space<vmem>>, %arg3: memref<16x128xbf16, #tpu.memory_space<vmem>>, %arg4: memref<2x32x128xf32, #tpu.memory_space<vmem>>) attributes {dimension_semantics = [#tpu.dimension_semantics<parallel>], iteration_bounds = array<i64: 2>, scalar_prefetch = 0 : i64, scratch_operands = 0 : i64, tpu.core_type = #tpu.core_type<tc>, window_params = [{pipeline_mode = #tpu.pipeline_mode<synchronous>, transform_indices = @transform_0, window_bounds = array<i64: 32, 16>}, {transform_indices = @transform_1, window_bounds = array<i64: 2, 16, 16>}, {pipeline_mode = #tpu.pipeline_mode<synchronous>, transform_indices = @transform_2, window_bounds = array<i64: 16, 128>}, {transform_indices = @transform_3, window_bounds = array<i64: 2, 32, 128>}]} {
    %c0 = arith.constant 0 : index
    %c0_0 = arith.constant 0 : index
    %0 = vector.load %arg1[%c0, %c0_0] : memref<32x16xbf16, #tpu.memory_space<vmem>>, vector<32x16xbf16>
    %c0_1 = arith.constant 0 : index
    %c0_2 = arith.constant 0 : index
    %1 = vector.load %arg3[%c0_1, %c0_2] : memref<16x128xbf16, #tpu.memory_space<vmem>>, vector<16x128xbf16>
    %c0_3 = arith.constant 0 : index
    %c0_4 = arith.constant 0 : index
    %c0_5 = arith.constant 0 : index
    %2 = vector.load %arg2[%c0_3, %c0_4, %c0_5] : memref<2x16x16xf32, #tpu.memory_space<vmem>>, vector<2x16x16xf32>
    %3 = arith.truncf %2 : vector<2x16x16xf32> to vector<2x16x16xbf16>
    %4 = vector.shape_cast %3 : vector<2x16x16xbf16> to vector<32x16xbf16>
    %cst = arith.constant dense<0.000000e+00> : vector<32x128xf32>
    %5 = tpu.matmul %4, %1, %cst {dimension_numbers = #tpu.dot_dimension_numbers<[1], [0], [0], [1], [0, 0, 1, 1], [], []>} : vector<32x16xbf16>, vector<16x128xbf16>, vector<32x128xf32> -> vector<32x128xf32>
    %6 = arith.truncf %5 : vector<32x128xf32> to vector<32x128xbf16>
    %7 = vector.extract_strided_slice %6 {offsets = [0, 0], sizes = [16, 128], strides = [1, 1]} : vector<32x128xbf16> to vector<16x128xbf16>
    %cst_6 = arith.constant dense<0.000000e+00> : vector<32x128xf32>
    %8 = tpu.matmul %0, %7, %cst_6 {dimension_numbers = #tpu.dot_dimension_numbers<[1], [0], [0], [1], [0, 0, 1, 1], [], []>} : vector<32x16xbf16>, vector<16x128xbf16>, vector<32x128xf32> -> vector<32x128xf32>
    %c0_7 = arith.constant 0 : index
    %c0_8 = arith.constant 0 : index
    %c0_9 = arith.constant 0 : index
    %9 = vector.load %arg4[%c0_7, %c0_8, %c0_9] : memref<2x32x128xf32, #tpu.memory_space<vmem>>, vector<1x32x128xf32>
    %10 = vector.shape_cast %9 : vector<1x32x128xf32> to vector<32x128xf32>
    %11 = vector.shape_cast %8 : vector<32x128xf32> to vector<1x32x128xf32>
    tpu.vector_store %arg4[%c0_7, %c0_8, %c0_9], %11 {strides = array<i32>} : memref<2x32x128xf32, #tpu.memory_space<vmem>>, vector<1x32x128xf32>,
    %12 = vector.extract_strided_slice %6 {offsets = [16, 0], sizes = [16, 128], strides = [1, 1]} : vector<32x128xbf16> to vector<16x128xbf16>
    %cst_10 = arith.constant dense<0.000000e+00> : vector<32x128xf32>
    %13 = tpu.matmul %0, %12, %cst_10 {dimension_numbers = #tpu.dot_dimension_numbers<[1], [0], [0], [1], [0, 0, 1, 1], [], []>} : vector<32x16xbf16>, vector<16x128xbf16>, vector<32x128xf32> -> vector<32x128xf32>
    %c1 = arith.constant 1 : index
    %c0_11 = arith.constant 0 : index
    %c0_12 = arith.constant 0 : index
    %14 = vector.load %arg4[%c1, %c0_11, %c0_12] : memref<2x32x128xf32, #tpu.memory_space<vmem>>, vector<1x32x128xf32>
    %15 = vector.shape_cast %14 : vector<1x32x128xf32> to vector<32x128xf32>
    %16 = vector.shape_cast %13 : vector<32x128xf32> to vector<1x32x128xf32>
    tpu.vector_store %arg4[%c1, %c0_11, %c0_12], %16 {strides = array<i32>} : memref<2x32x128xf32, #tpu.memory_space<vmem>>, vector<1x32x128xf32>,
    return
  }
  func.func @transform_0(%arg0: i32) -> (i32, i32) {
    %c0_i32 = arith.constant 0 : i32
    %c0_i32_0 = arith.constant 0 : i32
    %c0_i32_1 = arith.constant 0 : i32
    return %c0_i32, %c0_i32_0 : i32, i32
  }
  func.func @transform_1(%arg0: i32) -> (i32, i32, i32) {
    %c0_i32 = arith.constant 0 : i32
    %c0_i32_0 = arith.constant 0 : i32
    %c0_i32_1 = arith.constant 0 : i32
    return %arg0, %c0_i32, %c0_i32_0 : i32, i32, i32
  }
  func.func @transform_2(%arg0: i32) -> (i32, i32) {
    %c0_i32 = arith.constant 0 : i32
    %c0_i32_0 = arith.constant 0 : i32
    %c0_i32_1 = arith.constant 0 : i32
    return %c0_i32, %c0_i32_0 : i32, i32
  }
  func.func @transform_3(%arg0: i32) -> (i32, i32, i32) {
    %c0_i32 = arith.constant 0 : i32
    %c0_i32_0 = arith.constant 0 : i32
    %c0_i32_1 = arith.constant 0 : i32
    return %arg0, %c0_i32, %c0_i32_0 : i32, i32, i32
  }
}

</mosaic_0001>

<bundles_post_ra>
// kernel: tpu_custom_call.1
= control target key start
LH: loop header
LB: loop body
LE: loop exit
PB: predicated region body
PF: predicated region fallthrough
CT: control target
= control target key end

     0   :  { %8 = vsyncpa [#allocation3], 0  ;;  %s895_s0 = inlined_call_operand.vmem [shape: bf16[32,16], index: 0, kind: input, shape index: {}]   ;;  %s896_s1 = inlined_call_operand.hbm [shape: f32[4,16,16], index: 1, kind: input, shape index: {}]   ;;  %s897_s2 = inlined_call_operand.vmem [shape: bf16[16,128], index: 2, kind: input, shape index: {}]   ;;  %s898_s3 = inlined_call_operand.hbm [shape: f32[4,32,128], index: 3, kind: output, shape index: {}]  }
   0x1   :  { %10 = vsyncpa [#allocation3 + $0x1], 0 }
   0x2   :  { %11 = vsyncpa [#allocation4], 0 }
   0x3   :  { %13 = vsyncpa [#allocation4 + $0x1], 0  ;;  %s717_s12 = smov 0   ;;  %s719_s13 = smov 0  }
   0x4   :  { %s721_s14 = smov 0   ;;  %s723_s15 = smov 0  }
   0x5 LB: > { %s738_s16 = sadd.s32 4294967295, %s689_s15   ;;  %s480_s17 = sadd.s32 4294967294, %s689_s15   ;;  %s689_s15 = sphi %s723_s15, %s911_s15   ;;  %s685_s14 = sphi %s721_s14, %s910_s14   ;;  %s681_s13 = sphi %s719_s13, %s909_s13   ;;  %s677_s12 = sphi %s717_s12, %s908_s12  }
   0x6   : > { %s742_s18 = sadd.s32 1, %s689_s15   ;;  %s47_s19 = sadd.s32 1, %s685_s14 }
   0x7   : > { %s44_s20 = ssub.s32 %s689_s15, %s742_s18  ;;  %p54_p0 = scmp.ne.s32.totalorder %s685_s14, %s681_s13 }
   0x8   : > { %p45_p1 = scmp.eq.s32.totalorder %s44_s20, 0  ;;  %p55_p2 = scmp.eq.s32.totalorder %s689_s15, 0 }
   0x9   : > { %p60_p3 = scmp.ne.s32.totalorder %s681_s13, %s677_s12  ;;  %p61_p4 = scmp.eq.s32.totalorder %s738_s16, 0 }
   0xa   : > { %s754_s21 = scalar_select %p45_p1, %s685_s14, %s47_s19  }
   0xb   : > { %p756_p5 = por %p55_p2, %p54_p0  ;;  %p760_p6 = por %p61_p4, %p60_p3 }
   0xc   : > { %p105_p7 = scmp.eq.s32.totalorder %s738_s16, 1  ;;  %p111_p8 = scmp.eq.s32.totalorder %s480_s17, 1 }
   0xd   : > { %p552_p10 = scmp.lt.s32.totalorder %s689_s15, 2  ;;  %s137_s26 = sand.u32 1, %s685_s14  }
   0xe   : > { %p767_p11 = por %p105_p7, %p54_p0  ;;  %p771_p12 = por %p111_p8, %p60_p3 }
   0xf   : > { %s510_s27 = sshll.u32 %s689_s15, 9  ;;  %s483_s28 = sshll.u32 %s137_s26, 5 }
  0x10   : > { %s902_s24 = scalar_select %p767_p11, 1, 0 }
  0x11   : > { %s903_s25 = scalar_select %p771_p12, 1, 0 }
  0x12   : > { %s780_s4 = scalar_lea.hbm %s896_s1, %s510_s27  ;;  %s141_s5 = scalar_lea.vmem [#allocation2], %s483_s28 }
  0x13   : > { %s149_s6 = sshll.u32 %s141_s5, 4  ;;  %p784_p13 = pnand %p552_p10, %p756_p5  ;;  %s788_s6 = int_to_ptr.vmem [resolvable:$true] %s149_s6 }
  0x14   : > { %s790_s8 = scalar_lea.sflag [#allocation3], %s137_s26  ;;  %s593_s9 = scalar_lea.hbm %s780_s4, 512 }
  0x15   : > { %p594_p0 = scmp.ne.s32.totalorder %s780_s4, %s593_s9  ;;  %p595_p1 = pneg %p784_p13 }
  0x16   : > { %s598_s17 = scalar_lea.hbm %s896_s1, 1024  ;;  %p599_p4 = scmp.lt.u32.totalorder %s780_s4, %s896_s1 }
  0x17   : > { %p596_p2 = pnand %p595_p1, %p594_p0  ;;  %p600_p5 = scmp.lt.u32.totalorder %s598_s17, %s593_s9 }
  0x18   : > { %p602_p8 = scmp.lt.u32.totalorder %s593_s9, %s780_s4 }
  0x19   : > { %p597_p3 = pneg %p596_p2  ;;  %p601_p7 = por %p600_p5, %p599_p4 }
  0x1b   : > { %p603_p10 = por %p602_p8, %p601_p7 }
  0x1d   : > { %p604_p9 = pnand %p603_p10, %p597_p3 }
  0x1f   : > { %607 = shalt.err (!%p604_p9)
}
  0x20   : > { %s608_s22 = scalar_lea.vmem %s788_s6, 512  ;;  %s691_s26 = smov [#allocation2]  }
  0x21   : > { %p609_p0 = scmp.ne.s32.totalorder %s788_s6, %s608_s22  ;;  %s613_s27 = sshll.u32 %s691_s26, 4  ;;  %s614_s27 = int_to_ptr.vmem [resolvable:$false] %s613_s27 }
  0x22   : > { %s615_s28 = scalar_lea.vmem %s614_s27, 1024  ;;  %p616_p11 = scmp.lt.s32.totalorder %s788_s6, %s614_s27 }
  0x23   : > { %p611_p2 = pnand %p609_p0, %p595_p1  ;;  %p617_p4 = scmp.lt.s32.totalorder %s615_s28, %s608_s22 }
  0x25   : > { %p612_p12 = pneg %p611_p2  ;;  %p618_p5 = por %p617_p4, %p616_p11 }
  0x27   : > { %p619_p7 = pnand %p618_p5, %p612_p12 }
  0x29   : > { %622 = shalt.err (!%p619_p7)
}
  0x2a   : > { %s692_s29 = smov 128   ;;  %s693_s30 = smov 8  }
  0x2b   : > { %547 = dma.hbm_to_vmem [thread:$0]  (!%p784_p13), %s780_s4, 512, %s788_s6, %s790_s8, %s692_s29, %s692_s29, %s693_s30  }
  0x2c   : > { %p487_p9 = scmp.ge.s32.totalorder %s689_s15, 1  ;;  %p157_p1 = scmp.lt.s32.totalorder %s689_s15, 3 }
  0x2e   : > { %p158_p3 = pnand %p487_p9, %p157_p1 }
  0x2f   : > { %s821_s5 = sand.u32 (!%p158_p3), 1, %s681_s13  }
  0x30   : > { %161 = sbr.rel (%p158_p3) target bundleno = 512 (0x200), region = 32  ;;  %s488_s9 = sshll.u32 (!%p158_p3), %s821_s5, 5 }
  0x31   : > { %s164_s10 = scalar_lea.sflag (!%p158_p3), [#allocation3], %s821_s5  ;;  %s167_s11 = scalar_lea.vmem (!%p158_p3), [#allocation2], %s488_s9 }
  0x37   : > { %668 = dma.done.wait (%p760_p6), %s164_s10, 512  }
  0x38   : > { %670 = vsyncadd (%p760_p6), %s164_s10, 4294966784  ;;  %v590_v0 = vld [vmem:[%s897_s2] sm:$0xff]   ;;  %v199_v1 = vld [vmem:[%s167_s11] sm:$0xff]  ;;  %vm211_vm0 = vcmask 130048   ;;  %s489_s19 = sshll.u32 %s821_s5, 6  ;;  %s512_s26 = sshll.u32 %s738_s16, 10 }
  0x39   : > { %v200_v2 = vld [vmem:[%s167_s11 + $0x8] sm:$0xff]  ;;  %v201_v3 = vld [vmem:[%s167_s11 + $0x10] sm:$0xff]  ;;  %522 = vmatprep.subr.bf16.mxu0 %v590_v0  ;;  %v202_v5 = vld [vmem:[%s167_s11 + $0x18] sm:$0xff]  ;;  %s189_s20 = scalar_lea.vmem [#allocation5], %s489_s19  ;;  %s851_s29 = scalar_lea.hbm %s898_s3, %s512_s26 }
  0x3a   : > { %v203_v4 = vpack.c.bf16 %v200_v2, %v199_v1  ;;  %523 = vmatpush3.bf16.msra.mxu0 %v590_v0  ;;  %v204_v6 = vpack.c.bf16 %v202_v5, %v201_v3  ;;  %v591_v7 = vld [vmem:[%s895_s0] sm:$0xff]   ;;  %v592_v14 = vld [vmem:[%s895_s0 + $0x8] sm:$0xff]   ;;  %s407_s22 = sshll.u32 %s189_s20, 4  ;;  %s393_s16 = scalar_lea.sflag [#allocation4], %s821_s5  ;;  %s846_s22 = int_to_ptr.vmem [resolvable:$true] %s407_s22 }
  0x3b   : > { %530 = vmatprep.mubr.msk.bf16.mxu1 %vm211_vm0, %v591_v7  ;;  %s623_s30 = scalar_lea.vmem %s846_s22, 1024  ;;  %p905_p11 = scmp.ne.s32.totalorder %s902_s24, 0 }
  0x3c   : > { %524 = vmatprep.mubr.msk.bf16.mxu0 %vm211_vm0, %v203_v4  ;;  %p624_p6 = scmp.ne.s32.totalorder %s846_s22, %s623_s30  ;;  %s694_s9 = smov [#allocation5]  }
  0x3d   : > { %525 = vmatmul.mubr.msk.bf16.vlgmr.msra.gmra.mrb[0].mxu0 %vm211_vm0, %v204_v6  ;;  %s627_s10 = sshll.u32 %s694_s9, 4  ;;  %s628_s10 = int_to_ptr.vmem [resolvable:$false] %s627_s10 }
  0x3e   : > { %536 = vmatprep.mubr.msk.bf16.mxu0 %vm211_vm0, %v591_v7  ;;  %p625_p12 = pnand %p624_p6, %p905_p11  ;;  %s629_s11 = scalar_lea.vmem %s628_s10, 2048 }
  0x3f   : > { %p630_p8 = scmp.lt.s32.totalorder %s846_s22, %s628_s10  ;;  %p631_p10 = scmp.lt.s32.totalorder %s629_s11, %s623_s30 }
  0x40   : > { %p626_p13 = pneg %p625_p12 }
  0x41   : > { %p632_p0 = por %p631_p10, %p630_p8 }
  0x43   : > { %p633_p2 = pnand %p632_p0, %p626_p13 }
 0x110   : > { %v526_v8 = vpop.f32.mrb[0].mxu0 }
 0x111   : > { %v252_v9 = vpop.f32.mrb[1].mxu0 }
 0x112   : > { %v527_v10 = vpop.f32.mrb[2].mxu0 }
 0x113   : > { %v268_v11 = vpack.c.bf16 %v527_v10, %v526_v8  ;;  %v255_v12 = vpop.f32.mrb[3].mxu0 }
 0x114   : > { %v267_v13 = vpack.c.bf16 %v255_v12, %v252_v9 }
 0x115   : > { %534 = vmatprep.subr.bf16.mxu0 %v268_v11 }
 0x116   : > { %528 = vmatprep.subr.bf16.mxu1 %v267_v13  ;;  %535 = vmatpush3.bf16.msra.mxu0 %v268_v11 }
 0x117   : > { %529 = vmatpush3.bf16.msra.mxu1 %v267_v13 }
 0x119   : > { %537 = vmatmul.mubr.msk.bf16.vlgmr.msra.gmra.mrb[4].mxu0 %vm211_vm0, %v592_v14 }
 0x11a   : > { %531 = vmatmul.mubr.msk.bf16.vlgmr.msra.gmra.mrb[0].mxu1 %vm211_vm0, %v592_v14 }
 0x1ec   : > { %v538_v15 = vpop.f32.mrb[4].mxu0 }
 0x1ed   : > { %v532_v16 = vpop.f32.mrb[0].mxu1  ;;  %501 = vst [vmem:[%s189_s20 + $0x30] sm:$0xff] %v538_v15  ;;  %v372_v17 = vpop.f32.mrb[5].mxu0 }
 0x1ee   : > { %336 = vst [vmem:[%s189_s20 + $0x10] sm:$0xff] %v532_v16  ;;  %v319_v18 = vpop.f32.mrb[1].mxu1  ;;  %499 = vst [vmem:[%s189_s20 + $0x20] sm:$0xff] %v372_v17  ;;  %v539_v19 = vpop.f32.mrb[6].mxu0 }
 0x1ef   : > { %334 = vst [vmem:[%s189_s20] sm:$0xff] %v319_v18  ;;  %v533_v20 = vpop.f32.mrb[2].mxu1  ;;  %502 = vst [vmem:[%s189_s20 + $0x38] sm:$0xff] %v539_v19  ;;  %v375_v21 = vpop.f32.mrb[7].mxu0 }
 0x1f0   : > { %337 = vst [vmem:[%s189_s20 + $0x18] sm:$0xff] %v533_v20  ;;  %v322_v22 = vpop.f32.mrb[3].mxu1  ;;  %500 = vst [vmem:[%s189_s20 + $0x28] sm:$0xff] %v375_v21 }
 0x1f1   : > { %335 = vst [vmem:[%s189_s20 + $0x8] sm:$0xff] %v322_v22 }
 0x1f2   : > { %636 = shalt.err (!%p633_p2)
}
 0x1f3   : > { %s637_s7 = scalar_lea.hbm %s851_s29, 1024  ;;  %s641_s23 = scalar_lea.hbm %s898_s3, 2048 }
 0x1f4   : > { %p638_p4 = scmp.ne.s32.totalorder %s851_s29, %s637_s7  ;;  %p642_p9 = scmp.lt.u32.totalorder %s851_s29, %s898_s3 }
 0x1f5   : > { %p643_p1 = scmp.lt.u32.totalorder %s641_s23, %s637_s7  ;;  %p645_p6 = scmp.lt.u32.totalorder %s637_s7, %s851_s29 }
 0x1f6   : > { %p639_p5 = pnand %p638_p4, %p905_p11 }
 0x1f7   : > { %p644_p3 = por %p643_p1, %p642_p9 }
 0x1f8   : > { %p640_p7 = pneg %p639_p5 }
 0x1f9   : > { %p646_p12 = por %p645_p6, %p644_p3 }
 0x1fb   : > { %p647_p13 = pnand %p646_p12, %p640_p7 }
 0x1fd   : > { %650 = shalt.err (!%p647_p13)
}
 0x1fe   : > { %s695_s19 = smov 128   ;;  %s696_s20 = smov 8  }
 0x1ff   : > { %542 = dma.vmem_to_hbm [thread:$0]  (%p905_p11), %s846_s22, 1024, %s851_s29, %s393_s16, %s695_s19, %s695_s19, %s696_s20  }
 0x200 PF: > { %s422_s26 = sand.u32 1, %s677_s12   ;;  %p906_p8 = scmp.ne.s32.totalorder %s903_s25, 0 }
 0x201   : > { %p907_p10 = scmp.ge.s32.totalorder %s689_s15, 2  ;;  %s423_s27 = scalar_lea.sflag [#allocation4], %s422_s26 }
 0x203   : > { %p549_p0 = pnand %p907_p10, %p906_p8 }
 0x205   : > { %672 = dma.done.wait (!%p549_p0), %s423_s27, 1024  }
 0x206   : > { %674 = vsyncadd (!%p549_p0), %s423_s27, 4294966272  ;;  %p16_p2 = scmp.ge.s32.totalorder %s742_s18, 4   ;;  %s908_s12 = smov %s681_s13 }
 0x207   : > { %s909_s13 = smov %s685_s14  ;;  %s910_s14 = smov %s754_s21 }
 0x208   : > { %s911_s15 = smov %s742_s18  ;;  %18 = sbr.rel (!%p16_p2) target bundleno = 5 (0x5), region = 78 }
 0x20f   :  { %428 = vsyncpa [#allocation3], 1 }
 0x210   :  { %430 = vsyncpa [#allocation3 + $0x1], 1 }
 0x211   :  { %431 = vsyncpa [#allocation4], 1 }
 0x212   :  { %433 = vsyncpa [#allocation4 + $0x1], 1 }

</bundles_post_ra>
